<compile_context>
chip_gen: v7x
topology: tpu7x:2x2x1
jax: 0.10.0
libtpu: 0.0.40
codegen_flags: <defaults>
</compile_context>

<pallas_src>
import functools

import jax
import jax.numpy as jnp
from jax.experimental import pallas as pl
from jax.experimental.pallas import tpu as pltpu

LN_EPS = 1e-5


def _round_up(x, m):
    return (x + m - 1) // m * m


def _cdiv(a, b):
    return -(-a // b)


def _vmem_capacity_bytes():
    # Trace-time hardware query only; fall back to the smallest generation
    # (v7x, 64 MiB per TensorCore) if the query is unavailable.
    try:
        return int(pltpu.get_tpu_info().vmem_capacity_bytes)
    except Exception:
        return 64 * 1024 * 1024


def _prenorm_fn_kernel(x_ref, w_ref, bias_ref, o_ref, y_ref, *, eps):
    """Fused LayerNorm(last dim) + Linear (the wrapped `fn`).

    Grid = (row_tiles, col_tiles); the column axis is innermost, so for each
    row tile the LayerNorm is computed ONCE (at col tile 0) into the VMEM
    scratch `y_ref` and reused for every output-column tile.

    x_ref:    (TM, D)            rows of tokens
    w_ref:    (D, TN)  mxu_dt    fn (Linear) weight tile, gamma pre-folded in
    bias_ref: (1, TN)  f32       fn (Linear) bias tile, beta pre-folded in
    o_ref:    (TM, TN)
    y_ref:    (TM, D)  mxu_dt    normalized rows, cached across column tiles
    """
    @pl.when(pl.program_id(1) == 0)
    def _():
        x = x_ref[...].astype(jnp.float32)
        # Two-pass mean/variance (torch.nn.LayerNorm numerics).
        mean = jnp.mean(x, axis=-1, keepdims=True)
        xc = x - mean
        var = jnp.mean(xc * xc, axis=-1, keepdims=True)
        inv = jax.lax.rsqrt(var + eps)
        y_ref[...] = (xc * inv).astype(y_ref.dtype)

    out = jnp.dot(y_ref[...], w_ref[...], preferred_element_type=jnp.float32)
    o_ref[...] = (out + bias_ref[...]).astype(o_ref.dtype)


def dprenorm_linear(x, gamma, beta, w, bias, *,
                    tile_rows=None, tile_n=None,
                    mxu_dtype=jnp.bfloat16, out_dtype=None):
    """DPreNorm with fn = Linear.

    x: (B, N, D); gamma/beta: (D,); w: (D, DOUT); bias: (DOUT,).
    Returns (B, N, DOUT) in `out_dtype` (default: x.dtype).
    """
    B, N, D = x.shape
    DOUT = w.shape[1]
    M = B * N
    out_dtype = x.dtype if out_dtype is None else out_dtype

    x_itemsize = jnp.dtype(x.dtype).itemsize
    w_itemsize = jnp.dtype(mxu_dtype).itemsize
    out_itemsize = jnp.dtype(out_dtype).itemsize

    # ---- fold the LayerNorm affine into the Linear (trace time, f32) ----
    gamma_f = gamma.astype(jnp.float32)
    beta_f = beta.astype(jnp.float32)
    w_f = w.astype(jnp.float32)
    w_eff = (gamma_f[:, None] * w_f).astype(mxu_dtype)             # (D, DOUT)
    bias_eff = (beta_f @ w_f + bias.astype(jnp.float32))[None, :]  # (1, DOUT)

    # ---- output-column tile: single tile if DOUT fits, else 256-aligned ----
    tile_n_cap = 1024 if tile_n is None else max(128, int(tile_n))
    if DOUT <= tile_n_cap:
        tile_n = DOUT                       # full-extent block, no padding
        nn = 1
    else:
        nn = _cdiv(DOUT, tile_n_cap)
        tile_n = _round_up(_cdiv(DOUT, nn), 256)
        nn = _cdiv(DOUT, tile_n)            # last column block may be partial

    # ---- row tile: multiple of 16, capped by the (rounded) row count ----
    if tile_rows is None:
        tile_rows = 1024
    tile_rows = max(16, min(_round_up(int(tile_rows), 16), _round_up(M, 16)))

    # ---- generation-aware VMEM budget (incl. f32 LayerNorm temporaries) ----
    vmem_cap = _vmem_capacity_bytes()
    budget = int(0.55 * vmem_cap)

    def _vmem_bytes(tr, tn):
        return (2 * tr * D * x_itemsize          # x block, double-buffered
                + 2 * D * tn * w_itemsize        # w block, double-buffered
                + 2 * tr * tn * out_itemsize     # out block, double-buffered
                + tr * D * w_itemsize            # y scratch
                + 3 * tr * D * 4                 # f32 LayerNorm temporaries
                + 2 * tr * tn * 4                # f32 matmul acc + epilogue
                + 4 * tn * 4)                    # bias

    while _vmem_bytes(tile_rows, tile_n) > budget and tile_rows > 16:
        tile_rows = max(16, _round_up(tile_rows // 2, 16))
    while _vmem_bytes(tile_rows, tile_n) > budget and tile_n > 256:
        tile_n = max(256, _round_up(tile_n // 2, 128))
        nn = _cdiv(DOUT, tile_n)

    nm = _cdiv(M, tile_rows)                 # last row block may be partial

    x2 = x.reshape(M, D)                     # contiguous collapse: no copy

    kernel = functools.partial(_prenorm_fn_kernel, eps=LN_EPS)

    cost = pl.CostEstimate(
        flops=2 * M * D * DOUT + 7 * M * D,
        transcendentals=M,
        bytes_accessed=(M * D * x_itemsize + D * DOUT * w_itemsize
                        + M * DOUT * out_itemsize),
    )

    grid_spec = pltpu.PrefetchScalarGridSpec(
        num_scalar_prefetch=0,
        grid=(nm, nn),                       # rows OUTER, output cols INNER
        in_specs=[
            # x block index is constant along the inner axis -> fetched once
            # per row tile and reused for every output-column tile.
            pl.BlockSpec((tile_rows, D), lambda i, j: (i, 0)),
            pl.BlockSpec((D, tile_n), lambda i, j: (0, j)),
            pl.BlockSpec((1, tile_n), lambda i, j: (0, j)),
        ],
        out_specs=pl.BlockSpec((tile_rows, tile_n), lambda i, j: (i, j)),
        scratch_shapes=[pltpu.VMEM((tile_rows, D), mxu_dtype)],
    )

    out2 = pl.pallas_call(
        kernel,
        out_shape=jax.ShapeDtypeStruct((M, DOUT), out_dtype),
        grid_spec=grid_spec,
        compiler_params=pltpu.CompilerParams(
            # Row axis shards across TensorCores (v7x megacore); the column
            # axis carries the y scratch -> must be 'arbitrary'.
            dimension_semantics=("parallel", "arbitrary"),
            vmem_limit_bytes=int(0.8 * vmem_cap),
        ),
        cost_estimate=cost,
    )(x2, w_eff, bias_eff)

    return out2.reshape(B, N, DOUT)


def _reference(x, gamma, beta, w, bias):
    xf = x.astype(jnp.float32)
    mean = jnp.mean(xf, axis=-1, keepdims=True)
    var = jnp.mean((xf - mean) ** 2, axis=-1, keepdims=True)
    y = (xf - mean) * jax.lax.rsqrt(var + LN_EPS) * gamma + beta
    return jnp.einsum("bnd,de->bne", y, w) + bias


if __name__ == "__main__":
    key = jax.random.PRNGKey(0)
    # Small but non-trivial shapes: row count not a multiple of the row tile,
    # channel dims not multiples of 128, DOUT != D — exercises the cdiv row
    # grid, full-extent channel blocks and the LayerNorm scratch reuse.
    B, N, D = 2, 100, 48
    DOUT = 80

    kx, kg, kb, kw, kbi = jax.random.split(key, 5)
    x = jax.random.normal(kx, (B, N, D), dtype=jnp.float32)

    # nn.LayerNorm init (gamma=1, beta=0), perturbed so the affine is exercised.
    gamma = jnp.ones((D,), jnp.float32) + 0.01 * jax.random.normal(kg, (D,))
    beta = 0.01 * jax.random.normal(kb, (D,), dtype=jnp.float32)
    # fn (Linear) params.
    w = jax.random.normal(kw, (D, DOUT), dtype=jnp.float32) / jnp.sqrt(D)
    bias = 0.01 * jax.random.normal(kbi, (DOUT,), dtype=jnp.float32)

    out = dprenorm_linear(x, gamma, beta, w, bias, tile_rows=64)
    out = jax.block_until_ready(out)

    ref = _reference(x, gamma, beta, w, bias)
    assert out.shape == (B, N, DOUT), out.shape
    # bf16 MXU operands (f32 accumulate): tolerance loosened vs f32 reference.
    err = float(jnp.max(jnp.abs(out - ref)))
    assert jnp.allclose(out, ref, atol=5e-2, rtol=5e-2), err

    print("KERNEL_OK")
</pallas_src>

<mosaic_0001>
module attributes {stable_mosaic.version = 11 : i64} {
  func.func @_prenorm_fn_kernel(%arg0: i32, %arg1: i32, %arg2: memref<64x48xf32, #tpu.memory_space<vmem>>, %arg3: memref<48x80xbf16, #tpu.memory_space<vmem>>, %arg4: memref<1x80xf32, #tpu.memory_space<vmem>>, %arg5: memref<64x80xf32, #tpu.memory_space<vmem>>, %arg6: memref<64x48xbf16, #tpu.memory_space<vmem>>) attributes {dimension_semantics = [#tpu.dimension_semantics<parallel>, #tpu.dimension_semantics<arbitrary>], iteration_bounds = array<i64: 4, 1>, scalar_prefetch = 0 : i64, scratch_operands = 1 : i64, tpu.core_type = #tpu.core_type<tc>, window_params = [{transform_indices = @transform_0, window_bounds = array<i64: 64, 48>}, {transform_indices = @transform_1, window_bounds = array<i64: 48, 80>}, {transform_indices = @transform_2, window_bounds = array<i64: 1, 80>}, {transform_indices = @transform_3, window_bounds = array<i64: 64, 80>}]} {
    %c0_i32 = arith.constant 0 : i32
    %0 = arith.cmpi eq, %arg1, %c0_i32 : i32
    %1 = arith.extui %0 : i1 to i32
    %c0_i32_0 = arith.constant 0 : i32
    %2 = arith.cmpi ne, %1, %c0_i32_0 : i32
    scf.if %2 {
      %c0_8 = arith.constant 0 : index
      %c0_9 = arith.constant 0 : index
      %10 = vector.load %arg2[%c0_8, %c0_9] : memref<64x48xf32, #tpu.memory_space<vmem>>, vector<64x48xf32>
      %cst_10 = arith.constant dense<0.000000e+00> : vector<64xf32>
      %11 = vector.multi_reduction <add>, %10, %cst_10 [1] : vector<64x48xf32> to vector<64xf32>
      %12 = vector.shape_cast %11 : vector<64xf32> to vector<64x1xf32>
      %cst_11 = arith.constant 4.800000e+01 : f32
      %13 = vector.broadcast %cst_11 : f32 to vector<64x1xf32>
      %14 = arith.divf %12, %13 : vector<64x1xf32>
      %15 = vector.broadcast %14 : vector<64x1xf32> to vector<64x48xf32>
      %16 = arith.subf %10, %15 : vector<64x48xf32>
      %17 = arith.mulf %16, %16 : vector<64x48xf32>
      %cst_12 = arith.constant dense<0.000000e+00> : vector<64xf32>
      %18 = vector.multi_reduction <add>, %17, %cst_12 [1] : vector<64x48xf32> to vector<64xf32>
      %19 = vector.shape_cast %18 : vector<64xf32> to vector<64x1xf32>
      %cst_13 = arith.constant 4.800000e+01 : f32
      %20 = vector.broadcast %cst_13 : f32 to vector<64x1xf32>
      %21 = arith.divf %19, %20 : vector<64x1xf32>
      %cst_14 = arith.constant 9.99999974E-6 : f32
      %22 = vector.broadcast %cst_14 : f32 to vector<64x1xf32>
      %23 = arith.addf %21, %22 : vector<64x1xf32>
      %24 = math.rsqrt %23 : vector<64x1xf32>
      %25 = vector.broadcast %24 : vector<64x1xf32> to vector<64x48xf32>
      %26 = arith.mulf %16, %25 : vector<64x48xf32>
      %27 = arith.truncf %26 : vector<64x48xf32> to vector<64x48xbf16>
      %c0_15 = arith.constant 0 : index
      %c0_16 = arith.constant 0 : index
      %28 = vector.load %arg6[%c0_15, %c0_16] : memref<64x48xbf16, #tpu.memory_space<vmem>>, vector<64x48xbf16>
      tpu.vector_store %arg6[%c0_15, %c0_16], %27 {strides = array<i32>} : memref<64x48xbf16, #tpu.memory_space<vmem>>, vector<64x48xbf16>,
    } else {
    }
    %c0 = arith.constant 0 : index
    %c0_1 = arith.constant 0 : index
    %3 = vector.load %arg6[%c0, %c0_1] : memref<64x48xbf16, #tpu.memory_space<vmem>>, vector<64x48xbf16>
    %c0_2 = arith.constant 0 : index
    %c0_3 = arith.constant 0 : index
    %4 = vector.load %arg3[%c0_2, %c0_3] : memref<48x80xbf16, #tpu.memory_space<vmem>>, vector<48x80xbf16>
    %cst = arith.constant dense<0.000000e+00> : vector<64x80xf32>
    %5 = tpu.matmul %3, %4, %cst {dimension_numbers = #tpu.dot_dimension_numbers<[1], [0], [0], [1], [0, 0, 1, 1], [], []>} : vector<64x48xbf16>, vector<48x80xbf16>, vector<64x80xf32> -> vector<64x80xf32>
    %c0_4 = arith.constant 0 : index
    %c0_5 = arith.constant 0 : index
    %6 = vector.load %arg4[%c0_4, %c0_5] : memref<1x80xf32, #tpu.memory_space<vmem>>, vector<1x80xf32>
    %7 = vector.broadcast %6 : vector<1x80xf32> to vector<64x80xf32>
    %8 = arith.addf %5, %7 : vector<64x80xf32>
    %c0_6 = arith.constant 0 : index
    %c0_7 = arith.constant 0 : index
    %9 = vector.load %arg5[%c0_6, %c0_7] : memref<64x80xf32, #tpu.memory_space<vmem>>, vector<64x80xf32>
    tpu.vector_store %arg5[%c0_6, %c0_7], %8 {strides = array<i32>} : memref<64x80xf32, #tpu.memory_space<vmem>>, vector<64x80xf32>,
    return
  }
  func.func @transform_0(%arg0: i32, %arg1: i32) -> (i32, i32) {
    %c0_i32 = arith.constant 0 : i32
    %c0_i32_0 = arith.constant 0 : i32
    return %arg0, %c0_i32 : i32, i32
  }
  func.func @transform_1(%arg0: i32, %arg1: i32) -> (i32, i32) {
    %c0_i32 = arith.constant 0 : i32
    %c0_i32_0 = arith.constant 0 : i32
    return %c0_i32, %arg1 : i32, i32
  }
  func.func @transform_2(%arg0: i32, %arg1: i32) -> (i32, i32) {
    %c0_i32 = arith.constant 0 : i32
    %c0_i32_0 = arith.constant 0 : i32
    return %c0_i32, %arg1 : i32, i32
  }
  func.func @transform_3(%arg0: i32, %arg1: i32) -> (i32, i32) {
    %c0_i32 = arith.constant 0 : i32
    return %arg0, %arg1 : i32, i32
  }
}

</mosaic_0001>

<bundles_post_ra>
// kernel: tpu_custom_call.1
= control target key start
LH: loop header
LB: loop body
LE: loop exit
PB: predicated region body
PF: predicated region fallthrough
CT: control target
= control target key end

     0   :  { %s1079_s12 = smov 0   ;;  %s1081_s13 = smov 0   ;;  %s1291_s0 = inlined_call_operand.vmem [shape: f32[200,48], index: 0, kind: input, shape index: {}]   ;;  %s1292_s1 = inlined_call_operand.vmem [shape: bf16[48,80], index: 1, kind: input, shape index: {}]   ;;  %s1293_s2 = inlined_call_operand.vmem [shape: f32[1,80], index: 2, kind: input, shape index: {}]   ;;  %s1294_s3 = inlined_call_operand.vmem [shape: f32[200,80], index: 3, kind: output, shape index: {}]  }
   0x1   :  { %s1083_s14 = smov 0   ;;  %s1085_s15 = smov 0  }
   0x2   :  { %s1087_s16 = smov 0  }
   0x3 LB: > { %s767_s17 = sadd.s32 4294967295, %s1025_s16   ;;  %s25_s18 = sadd.s32 1, %s1021_s15  ;;  %s1025_s16 = sphi %s1087_s16, %s13_s16   ;;  %s1021_s15 = sphi %s1085_s15, %s1302_s15   ;;  %s1017_s14 = sphi %s1083_s14, %s1301_s14   ;;  %s1013_s13 = sphi %s1081_s13, %s1300_s13   ;;  %s1009_s12 = sphi %s1079_s12, %s1299_s12  }
   0x4   : > { %p27_p0 = scmp.ge.s32.totalorder %s25_s18, 4  ;;  %s112_s19 = sadd.s32 1, %s1013_s13 }
   0x5   : > { %p122_p1 = scmp.ne.s32.totalorder %s1013_s13, %s1009_s12  ;;  %p123_p2 = scmp.eq.s32.totalorder %s767_s17, 3 }
   0x6   : > { %s1304_s18 = smov (%p27_p0, %s25_s18), 0  ;;  %p773_p4 = scmp.ge.s32.totalorder %s1025_s16, 1 }
   0x7   : > { %p1111_p3 = por %p123_p2, %p122_p1  ;;  %s107_s21 = ssub.s32 %s1021_s15, %s1304_s18 }
   0x8   : > { %p177_p5 = scmp.lt.s32.totalorder %s1025_s16, 5  ;;  %p110_p6 = scmp.eq.s32.totalorder %s107_s21, 0 }
   0xa   : > { %p178_p7 = pnand %p773_p4, %p177_p5 }
   0xb   : > { %s1120_s22 = scalar_select %p110_p6, %s1013_s13, %s112_s19  }
   0xc   : > { %181 = sbr.rel (%p178_p7) target bundleno = 626 (0x272), region = 32  ;;  %s1123_s23 = sshll.u32 (!%p178_p7), %s1017_s14, 3  ;;  %vm250_vm0 = vcmask (!%p178_p7), 392192   ;;  %v936_v56 = vld [vmem:[%s1292_s1] sm:$0xff] (!%p178_p7)   ;;  %v937_v57 = vld [vmem:[%s1292_s1 + $0x8] sm:$0xff] (!%p178_p7)   ;;  %v938_v58 = vld [vmem:[%s1292_s1 + $0x10] sm:$0xff] (!%p178_p7)  }
   0xd   : > { %p216_p8 = scmp.lt.s32.totalorder (!%p178_p7), %s1123_s23, 24  ;;  %812 = vmatprep.subr.bf16.mxu0 (!%p178_p7), %v936_v56  ;;  %826 = vmatprep.subr.bf16.mxu1 (!%p178_p7), %v936_v56  ;;  %s208_s8 = sand.u32 (!%p178_p7), 1, %s1009_s12   ;;  %vm477_vm1 = vcmask (!%p178_p7), 654336  }
   0xe   : > { %813 = vmatpush3.bf16.msra.mxu0 (!%p178_p7), %v936_v56  ;;  %829 = vmatpush3.bf16.msra.mxu1 (!%p178_p7), %v936_v56  ;;  %s774_s9 = sshll.u32 (!%p178_p7), %s208_s8, 6 }
   0xf   : > { %814 = vmatprep.subr.bf16.mxu0 (!%p178_p7), %v937_v57  ;;  %827 = vmatprep.subr.bf16.mxu1 (!%p178_p7), %v937_v57  ;;  %s1207_s17 = scalar_lea.vmem (!%p178_p7), [#allocation3], %s774_s9  }
  0x12   : > { %815 = vmatpush3.bf16.msra.mxu0 (!%p178_p7), %v937_v57  ;;  %830 = vmatpush3.bf16.msra.mxu1 (!%p178_p7), %v937_v57 }
  0x13   : > { %s217_s24 = scalar_select %p216_p8, %s1123_s23, 24  ;;  %816 = vmatprep.subr.bf16.mxu0 %v938_v58  ;;  %828 = vmatprep.subr.bf16.mxu1 %v938_v58 }
  0x14   : > { %s494_s12 = ssub.s32 (%p1111_p3), 25, %s1123_s23  ;;  %s802_s19 = sshll.u32 (%p1111_p3), %s1017_s14, 6 }
  0x15   : > { %s776_s25 = sshll.u32 %s217_s24, 3  ;;  %p495_p9 = scmp.lt.s32.totalorder (%p1111_p3), %s494_s12, 8 }
  0x16   : > { %s219_s28 = scalar_lea.vmem %s1291_s0, %s776_s25  ;;  %817 = vmatpush3.bf16.msra.mxu0 %v938_v58  ;;  %831 = vmatpush3.bf16.msra.mxu1 %v938_v58  ;;  %s1232_s25 = scalar_lea.vmem (%p1111_p3), %s1294_s3, %s802_s19  }
  0x17   : > { %v242_v0 = vld [vmem:[%s219_s28] sm:$0xff]  ;;  %v243_v2 = vld [vmem:[%s219_s28 + $0x8] sm:$0xff]  ;;  %v244_v8 = vld [vmem:[%s219_s28 + $0x10] sm:$0xff] }
  0x18   : > { %v246_v1 = vld [vmem:[%s219_s28 + $0x20] sm:$0xff]  ;;  %v251_v3 = vsel %vm250_vm0, %v242_v0, 0.0  ;;  %v247_v5 = vld [vmem:[%s219_s28 + $0x28] sm:$0xff]  ;;  %v254_v6 = vsel %vm250_vm0, %v243_v2, 0.0  ;;  %v245_v9 = vld [vmem:[%s219_s28 + $0x18] sm:$0xff]  ;;  %v257_v10 = vsel %vm250_vm0, %v244_v8, 0.0 }
  0x19   : > { %v263_v4 = vsel %vm250_vm0, %v246_v1, 0.0  ;;  %252 = vadd.xlane.f32.xlu0 %v251_v3  ;;  %v266_v7 = vsel %vm250_vm0, %v247_v5, 0.0  ;;  %v260_v11 = vsel %vm250_vm0, %v245_v9, 0.0  ;;  %v248_v12 = vld [vmem:[%s219_s28 + $0x30] sm:$0xff]  ;;  %v249_v13 = vld [vmem:[%s219_s28 + $0x38] sm:$0xff] }
  0x1a   : > { %264 = vadd.xlane.f32.xlu1 %v263_v4  ;;  %v269_v14 = vsel %vm250_vm0, %v248_v12, 0.0  ;;  %v272_v15 = vsel %vm250_vm0, %v249_v13, 0.0 }
  0x1d   : > { %255 = vadd.xlane.f32.xlu0 %v254_v6 }
  0x1e   : > { %267 = vadd.xlane.f32.xlu1 %v266_v7 }
  0x21   : > { %258 = vadd.xlane.f32.xlu0 %v257_v10 }
  0x22   : > { %261 = vadd.xlane.f32.xlu1 %v260_v11 }
  0x25   : > { %270 = vadd.xlane.f32.xlu0 %v269_v14 }
  0x26   : > { %273 = vadd.xlane.f32.xlu1 %v272_v15 }
  0xa6   : > { %v253_v16 = vpop.xlane.xlu0 %252 }
  0xa7   : > { %v265_v17 = vpop.xlane.xlu1 %264  ;;  %v276_v18 = vmul.f32 0.020833334, %v253_v16 }
  0xa8   : > { %v280_v19 = vmul.f32 0.020833334, %v265_v17 }
  0xa9   : > { %v1138_v20 = vsub.f32 %v242_v0, %v276_v18 }
  0xaa   : > { %v1140_v21 = vsub.f32 %v246_v1, %v280_v19  ;;  %v256_v22 = vpop.xlane.xlu0 %255 }
  0xab   : > { %v268_v23 = vpop.xlane.xlu1 %267  ;;  %v277_v24 = vmul.f32 0.020833334, %v256_v22  ;;  %v292_v26 = vmul.f32 %v1138_v20, %v1138_v20 }
  0xac   : > { %v281_v25 = vmul.f32 0.020833334, %v268_v23  ;;  %v296_v27 = vmul.f32 %v1140_v21, %v1140_v21 }
  0xad   : > { %v1146_v28 = vsub.f32 %v243_v2, %v277_v24  ;;  %v300_v30 = vsel %vm250_vm0, %v292_v26, 0.0 }
  0xae   : > { %v1148_v29 = vsub.f32 %v247_v5, %v281_v25  ;;  %301 = vadd.xlane.f32.xlu0 %v300_v30  ;;  %v259_v31 = vpop.xlane.xlu0 %258  ;;  %v312_v33 = vsel %vm250_vm0, %v296_v27, 0.0 }
  0xaf   : > { %v262_v32 = vpop.xlane.xlu1 %261  ;;  %v278_v34 = vmul.f32 0.020833334, %v259_v31  ;;  %v293_v36 = vmul.f32 %v1146_v28, %v1146_v28 }
  0xb0   : > { %v279_v35 = vmul.f32 0.020833334, %v262_v32  ;;  %v297_v37 = vmul.f32 %v1148_v29, %v1148_v29 }
  0xb1   : > { %v1156_v38 = vsub.f32 %v244_v8, %v278_v34  ;;  %v303_v40 = vsel %vm250_vm0, %v293_v36, 0.0 }
  0xb2   : > { %v1158_v39 = vsub.f32 %v245_v9, %v279_v35  ;;  %313 = vadd.xlane.f32.xlu0 %v312_v33  ;;  %304 = vadd.xlane.f32.xlu1 %v303_v40  ;;  %v271_v41 = vpop.xlane.xlu0 %270  ;;  %v315_v43 = vsel %vm250_vm0, %v297_v37, 0.0 }
  0xb3   : > { %v274_v42 = vpop.xlane.xlu1 %273  ;;  %v282_v44 = vmul.f32 0.020833334, %v271_v41  ;;  %v294_v46 = vmul.f32 %v1156_v38, %v1156_v38 }
  0xb4   : > { %v283_v45 = vmul.f32 0.020833334, %v274_v42  ;;  %v295_v47 = vmul.f32 %v1158_v39, %v1158_v39 }
  0xb5   : > { %v1166_v48 = vsub.f32 %v248_v12, %v282_v44  ;;  %v306_v50 = vsel %vm250_vm0, %v294_v46, 0.0 }
  0xb6   : > { %v1168_v49 = vsub.f32 %v249_v13, %v283_v45  ;;  %316 = vadd.xlane.f32.xlu1 %v315_v43  ;;  %307 = vadd.xlane.f32.xlu0 %v306_v50  ;;  %v309_v51 = vsel %vm250_vm0, %v295_v47, 0.0  ;;  %v777_v43 = vld [vmem:[%s1293_s2] ss:$0 sm:$0xff] }
  0xb7   : > { %v298_v52 = vmul.f32 %v1166_v48, %v1166_v48 }
  0xb8   : > { %v299_v53 = vmul.f32 %v1168_v49, %v1168_v49 }
  0xb9   : > { %v318_v54 = vsel %vm250_vm0, %v298_v52, 0.0 }
  0xba   : > { %310 = vadd.xlane.f32.xlu1 %v309_v51  ;;  %319 = vadd.xlane.f32.xlu0 %v318_v54  ;;  %v321_v55 = vsel %vm250_vm0, %v299_v53, 0.0 }
  0xbe   : > { %322 = vadd.xlane.f32.xlu1 %v321_v55 }
 0x13b   : > { %v302_v59 = vpop.xlane.xlu0 %301 }
 0x13c   : > { %v324_v60 = vmul.f32 0.020833334, %v302_v59 }
 0x13e   : > { %v332_v61 = vadd.f32 1e-05, %v324_v60 }
 0x13f   : > { %v305_v62 = vpop.xlane.xlu1 %304  ;;  %v314_v63 = vpop.xlane.xlu0 %313 }
 0x140   : > { %v325_v0 = vmul.f32 0.020833334, %v305_v62  ;;  %v328_v1 = vmul.f32 0.020833334, %v314_v63  ;;  %939 = vrsqrt.f32 %v332_v61 }
 0x142   : > { %v333_v2 = vadd.f32 1e-05, %v325_v0  ;;  %v336_v3 = vadd.f32 1e-05, %v328_v1 }
 0x143   : > { %v317_v4 = vpop.xlane.xlu1 %316  ;;  %v308_v5 = vpop.xlane.xlu0 %307 }
 0x144   : > { %941 = vrsqrt.f32 %v333_v2  ;;  %v329_v6 = vmul.f32 0.020833334, %v317_v4  ;;  %v326_v7 = vmul.f32 0.020833334, %v308_v5 }
 0x145   : > { %943 = vrsqrt.f32 %v336_v3 }
 0x146   : > { %v337_v8 = vadd.f32 1e-05, %v329_v6  ;;  %v334_v9 = vadd.f32 1e-05, %v326_v7 }
 0x147   : > { %v311_v10 = vpop.xlane.xlu1 %310  ;;  %v320_v11 = vpop.xlane.xlu0 %319 }
 0x148   : > { %945 = vrsqrt.f32 %v337_v8  ;;  %v327_v12 = vmul.f32 0.020833334, %v311_v10  ;;  %v330_v13 = vmul.f32 0.020833334, %v320_v11 }
 0x149   : > { %947 = vrsqrt.f32 %v334_v9 }
 0x14a   : > { %v335_v14 = vadd.f32 1e-05, %v327_v12  ;;  %v338_v15 = vadd.f32 1e-05, %v330_v13  ;;  %v940_v17 = vpop.eup %939 }
 0x14b   : > { %v323_v16 = vpop.xlane.xlu1 %322  ;;  %v348_v23 = vmul.f32 %v940_v17, %v1138_v20 }
 0x14c   : > { %949 = vrsqrt.f32 %v335_v14  ;;  %v331_v18 = vmul.f32 0.020833334, %v323_v16 }
 0x14d   : > { %951 = vrsqrt.f32 %v338_v15 }
 0x14e   : > { %v942_v19 = vpop.eup %941  ;;  %v339_v22 = vadd.f32 1e-05, %v331_v18 }
 0x14f   : > { %v349_v24 = vmul.f32 %v942_v19, %v1146_v28  ;;  %v944_v25 = vpop.eup %943 }
 0x150   : > { %953 = vrsqrt.f32 %v339_v22  ;;  %v352_v30 = vmul.f32 %v944_v25, %v1140_v21 }
 0x151   : > { %v356_v26 = vpack.c.bf16 %v349_v24, %v348_v23 }
 0x152   : > { %v946_v27 = vpop.eup %945 }
 0x153   : > { %360 = vst.msk [vmem:[#allocation2] sm:$0xff] %vm250_vm0, %v356_v26  ;;  %v353_v31 = vmul.f32 %v946_v27, %v1148_v29  ;;  %v948_v32 = vpop.eup %947 }
 0x154   : > { %v350_v35 = vmul.f32 %v948_v32, %v1156_v38 }
 0x155   : > { %v358_v33 = vpack.c.bf16 %v353_v31, %v352_v30 }
 0x156   : > { %v950_v34 = vpop.eup %949 }
 0x157   : > { %362 = vst.msk [vmem:[#allocation2 + $0x10] sm:$0xff] %vm250_vm0, %v358_v33  ;;  %v351_v20 = vmul.f32 %v950_v34, %v1158_v39  ;;  %v952_v28 = vpop.eup %951 }
 0x158   : > { %v354_v21 = vmul.f32 %v952_v28, %v1166_v48 }
 0x159   : > { %v357_v36 = vpack.c.bf16 %v351_v20, %v350_v35 }
 0x15a   : > { %v954_v37 = vpop.eup %953  ;;  %v364_v40 = vld [vmem:[#allocation2] sm:$0xff] }
 0x15b   : > { %361 = vst.msk [vmem:[#allocation2 + $0x8] sm:$0xff] %vm250_vm0, %v357_v36  ;;  %v355_v29 = vmul.f32 %v954_v37, %v1168_v49  ;;  %818 = vmatprep.mubr.msk.bf16.mxu0 %vm250_vm0, %v364_v40 }
 0x15d   : > { %v359_v41 = vpack.c.bf16 %v355_v29, %v354_v21 }
 0x15e   : > { %v366_v42 = vld [vmem:[#allocation2 + $0x10] sm:$0xff] }
 0x15f   : > { %363 = vst.msk [vmem:[#allocation2 + $0x18] sm:$0xff] %vm250_vm0, %v359_v41  ;;  %822 = vmatprep.mubr.msk.bf16.mxu1 %vm250_vm0, %v366_v42 }
 0x162   : > { %v365_v38 = vld [vmem:[#allocation2 + $0x8] sm:$0xff] }
 0x163   : > { %819 = vmatmul.mubr.msk.bf16.vlgmr.msra.gmra.mrb[0].mxu0 %vm250_vm0, %v365_v38 }
 0x166   : > { %v367_v39 = vld [vmem:[#allocation2 + $0x18] sm:$0xff] }
 0x167   : > { %823 = vmatmul.mubr.msk.bf16.vlgmr.msra.gmra.mrb[0].mxu1 %vm250_vm0, %v367_v39 }
 0x236   : > { %v820_v44 = vpop.f32.mrb[0].mxu0 }
 0x237   : > { %v455_v45 = vadd.f32 %v820_v44, %v777_v43  ;;  %v446_v46 = vpop.f32.mrb[1].mxu0 }
 0x238   : > { %v447_v47 = vadd.f32 %v777_v43, %v446_v46  ;;  %v821_v48 = vpop.f32.mrb[2].mxu0 }
 0x239   : > { %480 = vst.msk [vmem:[%s1207_s17 + $0x10] sm:$0xff] %vm477_vm1, %v455_v45  ;;  %v458_v49 = vadd.f32 %v821_v48, %v777_v43  ;;  %v449_v50 = vpop.f32.mrb[3].mxu0 }
 0x23a   : > { %478 = vst.msk [vmem:[%s1207_s17] sm:$0xff] %vm477_vm1, %v447_v47  ;;  %v450_v51 = vadd.f32 %v777_v43, %v449_v50  ;;  %v824_v52 = vpop.f32.mrb[0].mxu1  ;;  %492 = sbr.rel (!%p1111_p3) target bundleno = 626 (0x272), region = 40 }
 0x23b   : > { %481 = vst.msk [vmem:[%s1207_s17 + $0x18] sm:$0xff] %vm477_vm1, %v458_v49  ;;  %v471_v53 = vadd.f32 %v824_v52, %v777_v43  ;;  %v462_v54 = vpop.f32.mrb[1].mxu1 }
 0x23c   : > { %479 = vst.msk [vmem:[%s1207_s17 + $0x8] sm:$0xff] %vm477_vm1, %v450_v51  ;;  %v463_v55 = vadd.f32 %v777_v43, %v462_v54  ;;  %v825_v56 = vpop.f32.mrb[2].mxu1 }
 0x23d   : > { %484 = vst.msk [vmem:[%s1207_s17 + $0x30] sm:$0xff] %vm477_vm1, %v471_v53  ;;  %v474_v57 = vadd.f32 %v825_v56, %v777_v43  ;;  %v465_v58 = vpop.f32.mrb[3].mxu1 }
 0x23e   : > { %482 = vst.msk [vmem:[%s1207_s17 + $0x20] sm:$0xff] %vm477_vm1, %v463_v55  ;;  %v466_v59 = vadd.f32 %v777_v43, %v465_v58 }
 0x23f   : > { %485 = vst.msk [vmem:[%s1207_s17 + $0x38] sm:$0xff] %vm477_vm1, %v474_v57 }
 0x240   : > { %483 = vst.msk [vmem:[%s1207_s17 + $0x28] sm:$0xff] %vm477_vm1, %v466_v59 }
 0x241   : > { %s1306_s12 = smov (!%p495_p9, %s494_s12), 8 }
 0x242   : > { %s787_s26 = sshll.u32 %s1306_s12, 7 }
 0x243   : > { %p790_p10 = scmp.eq.s32.totalorder %s787_s26, 0 }
 0x244   : > { %s1238_s27 = sshrl.u32 (!%p790_p10), %s1306_s12, 3 }
 0x245   : > { %504 = sbr.rel (%p790_p10) target bundleno = 626 (0x272), region = 44  ;;  %p791_p11 = scmp.le.s32.totalorder (!%p790_p10), %s1238_s27, 0 }
 0x24c   : > { %697 = sbr.rel (%p791_p11) target bundleno = 605 (0x25d), region = 126  ;;  %s1296_s14 = smov (!%p791_p11), %s1232_s25 }
 0x24d   : > { %s1297_s20 = smov (!%p791_p11), %s1207_s17  ;;  %s1247_s23 = smov (!%p791_p11), 0  }
 0x24e   : > { %s1249_s28 = smov (!%p791_p11), 0  }
 0x253 LB: >> { %v580_v60 = vld [vmem:[%s1033_s20] sm:$0xff]  ;;  %v582_v61 = vld [vmem:[%s1033_s20 + $0x8] sm:$0xff]  ;;  %v584_v62 = vld [vmem:[%s1033_s20 + $0x10] sm:$0xff]  ;;  %s596_s29 = sadd.s32 1, %s1037_s23  ;;  %s574_s28 = sadd.s32 1, %s1041_s28   ;;  %s1041_s28 = sphi %s1249_s28, %s574_s28   ;;  %s1037_s23 = sphi %s1247_s23, %s1298_s23   ;;  %s1033_s20 = sphi %s1297_s20, %s601_s20   ;;  %s1029_s14 = sphi %s1296_s14, %s602_s14  }
 0x254   : >> { %581 = vst [vmem:[%s1029_s14] sm:$0xff] %v580_v60  ;;  %583 = vst [vmem:[%s1029_s14 + $0x8] sm:$0xff] %v582_v61  ;;  %v586_v63 = vld [vmem:[%s1033_s20 + $0x18] sm:$0xff]  ;;  %v588_v0 = vld [vmem:[%s1033_s20 + $0x20] sm:$0xff]  ;;  %p597_p12 = scmp.ge.s32.totalorder %s596_s29, %s1238_s27  ;;  %p573_p13 = scmp.ge.s32.totalorder %s574_s28, %s1238_s27 }
 0x255   : >> { %585 = vst [vmem:[%s1029_s14 + $0x10] sm:$0xff] %v584_v62  ;;  %v590_v1 = vld [vmem:[%s1033_s20 + $0x28] sm:$0xff]  ;;  %587 = vst [vmem:[%s1029_s14 + $0x18] sm:$0xff] %v586_v63  ;;  %v592_v2 = vld [vmem:[%s1033_s20 + $0x30] sm:$0xff] }
 0x256   : >> { %589 = vst [vmem:[%s1029_s14 + $0x20] sm:$0xff] %v588_v0  ;;  %591 = vst [vmem:[%s1029_s14 + $0x28] sm:$0xff] %v590_v1  ;;  %v594_v3 = vld [vmem:[%s1033_s20 + $0x38] sm:$0xff]  ;;  %s1308_s29 = smov (%p597_p12, %s596_s29), 0  ;;  %576 = sbr.rel (!%p573_p13) target bundleno = 595 (0x253), region = 132 }
 0x257   : >> { %593 = vst [vmem:[%s1029_s14 + $0x30] sm:$0xff] %v592_v2  ;;  %595 = vst [vmem:[%s1029_s14 + $0x38] sm:$0xff] %v594_v3  ;;  %s792_s30 = sshll.u32 %s1308_s29, 6  ;;  %s1298_s23 = smov %s1308_s29 }
 0x258   : >> { %s601_s20 = scalar_lea.vmem %s1207_s17, %s792_s30 [#allocation3]   ;;  %s602_s14 = scalar_lea.vmem %s1232_s25, %s792_s30  }
 0x25d PF: > { %s1268_s4 = sand.u32 7, %s1306_s12   ;;  %s803_s5 = sshll.u32 %s1238_s27, 6 }
 0x25e   : > { %s607_s6 = scalar_lea.vmem %s1207_s17, %s803_s5 [#allocation3]   ;;  %s609_s7 = scalar_lea.vmem %s1232_s25, %s803_s5  }
 0x25f   : > { %p797_p0 = scmp.le.s32.totalorder %s1268_s4, 0 }
 0x260   : > { %s1043_s8 = smov (!%p797_p0), %s609_s7   ;;  %s1047_s9 = smov (!%p797_p0), %s607_s6  }
 0x261   : > { %711 = sbr.rel (%p797_p0) target bundleno = 626 (0x272), region = 137  ;;  %s1051_s10 = smov (!%p797_p0), 0  }
 0x262   : > { %s1055_s11 = smov (!%p797_p0), 0  }
 0x268 LB: >> { %v619_v4 = vld [vmem:[%s1049_s9] sm:$0xff]  ;;  %s621_s12 = sadd.s32 1, %s1053_s10  ;;  %s613_s11 = sadd.s32 1, %s1057_s11   ;;  %s1057_s11 = sphi %s1055_s11, %s613_s11   ;;  %s1053_s10 = sphi %s1051_s10, %s1052_s10   ;;  %s1049_s9 = sphi %s1047_s9, %s626_s9   ;;  %s1045_s8 = sphi %s1043_s8, %s627_s8  }
 0x269   : >> { %620 = vst [vmem:[%s1045_s8] sm:$0xff] %v619_v4  ;;  %p622_p1 = scmp.ge.s32.totalorder %s621_s12, %s1268_s4  ;;  %p612_p2 = scmp.ge.s32.totalorder %s613_s11, %s1268_s4 }
 0x26b   : >> { %s1310_s12 = smov (%p622_p1, %s621_s12), 0  ;;  %615 = sbr.rel (!%p612_p2) target bundleno = 616 (0x268), region = 143 }
 0x26c   : >> { %s798_s17 = sshll.u32 %s1310_s12, 3  ;;  %s1052_s10 = smov %s1310_s12  }
 0x26d   : >> { %s626_s9 = scalar_lea.vmem %s607_s6, %s798_s17 [#allocation3]   ;;  %s627_s8 = scalar_lea.vmem %s609_s7, %s798_s17  }
 0x272 PF: > { %s13_s16 = sadd.s32 1, %s1025_s16   ;;  %s1299_s12 = smov %s1013_s13 }
 0x273   : > { %p10_p3 = scmp.ge.s32.totalorder %s13_s16, 6   ;;  %s1300_s13 = smov %s1120_s22 }
 0x274   : > { %s1301_s14 = smov %s1021_s15  ;;  %s1302_s15 = smov %s1304_s18 }
 0x275   :  { %12 = sbr.rel (!%p10_p3) target bundleno = 3 (0x3), region = 154 }

</bundles_post_ra>
